<compile_context>
chip_gen: v7x
topology: tpu7x:2x2x1
jax: 0.10.0
libtpu: 0.0.40
codegen_flags: <defaults>
</compile_context>

<pallas_src>
import jax
import jax.numpy as jnp
from jax.experimental import pallas as pl
from jax.experimental.pallas import tpu as pltpu

LOG_STD_BOUNDS = (-10.0, 2.0)   # log_std_bounds used by drq configs


def _round_up(x, m):
    return ((x + m - 1) // m) * m


def _choose_tk(repr_dim, tk_max=2048):
    """Pick a lane-aligned K tile that minimizes zero-padded w1 rows
    (padding rows are streamed from HBM every pass); tie-break: larger tk."""
    k_aligned = _round_up(repr_dim, 128)
    tk_cap = min(max(tk_max, 128), k_aligned)
    best_tk, best_pad = 128, None
    for tk in range(128, tk_cap + 1, 128):
        pad = _round_up(repr_dim, tk) - repr_dim
        if best_pad is None or pad < best_pad or (pad == best_pad and tk > best_tk):
            best_tk, best_pad = tk, pad
    return best_tk


def _default_vmem_budget():
    """Per-chip VMEM budget for kernel buffers (leaves headroom for the
    compiler's own temporaries).  v7x: ~48 MiB, v5e/v6e: ~100 MiB."""
    cap = 64 * 1024 * 1024
    try:
        info = pltpu.get_tpu_info()
        cap = int(getattr(info, "vmem_capacity_bytes", cap))
    except Exception:
        pass
    return max(32 * 1024 * 1024, min(cap - 16 * 1024 * 1024, 100 * 1024 * 1024))


def _choose_tm(b_pad, tk, h_pad, a_pad, budget):
    """Largest 8-multiple batch tile that fits the VMEM budget.  Bigger tm =>
    fewer M tiles => fewer full re-streams of w1 from HBM (the dominant cost)."""
    # Resident (single-buffered) constants: w2, merged head, biases.
    const_bytes = (h_pad * h_pad * 2 + h_pad * 2 * a_pad * 2
                   + (2 * h_pad + 2 * a_pad) * 4)
    # Double-buffered w1 K-tiles (bf16).
    w1_bytes = 2 * tk * h_pad * 2
    fixed = const_bytes + w1_bytes
    per_row = (2 * tk * 4            # obs tiles, f32, double-buffered
               + h_pad * 4           # f32 accumulator scratch
               + 2 * 2 * a_pad * 4   # mu/std outputs, f32, double-buffered
               + 2 * h_pad * 2       # epilogue temporaries h / h2 (bf16)
               + 3 * 2 * a_pad * 4)  # epilogue temporaries out / ls / exp (f32)
    avail = budget - fixed
    tm = max(8, (avail // per_row) // 8 * 8)
    return int(min(tm, b_pad))


# -----------------------------------------------------------------------------
# Kernel
# -----------------------------------------------------------------------------
def actor_kernel(obs_ref, w1_ref, b1_ref, w2_ref, b2_ref, w3_ref, b3_ref,
                 mu_ref, std_ref, acc_ref):
    k = pl.program_id(1)

    # obs tile arrives f32; cast to bf16 on the VPU right before the MXU dot
    # (avoids a separate wrapper-side pad/cast HBM pass).
    x = obs_ref[...].astype(w1_ref.dtype)
    partial = jnp.dot(x, w1_ref[...], preferred_element_type=jnp.float32)

    @pl.when(k == 0)
    def _():
        acc_ref[...] = partial            # direct write: no zero-fill + RMW

    @pl.when(k > 0)
    def _():
        acc_ref[...] += partial

    @pl.when(k == pl.num_programs(1) - 1)
    def _():
        # Layer 1 bias + ReLU (f32), then layer 2 + merged head.
        h = jnp.maximum(acc_ref[...] + b1_ref[...], 0.0).astype(w2_ref.dtype)

        h2 = jnp.dot(h, w2_ref[...],
                     preferred_element_type=jnp.float32) + b2_ref[...]
        h2 = jnp.maximum(h2, 0.0).astype(w3_ref.dtype)

        # Single N = 2*a_pad head dot (full MXU column width on v6e/v7x);
        # split mu / log_std at the lane-aligned a_pad boundary.
        out = jnp.dot(h2, w3_ref[...],
                      preferred_element_type=jnp.float32) + b3_ref[...]
        a_pad = out.shape[-1] // 2
        mu = out[:, :a_pad]
        ls = jnp.tanh(out[:, a_pad:])
        lo, hi = LOG_STD_BOUNDS
        ls = lo + 0.5 * (hi - lo) * (ls + 1.0)

        mu_ref[...] = mu.astype(mu_ref.dtype)
        std_ref[...] = jnp.exp(ls).astype(std_ref.dtype)
        # TODO(synk): TruncatedNormal sampling (the dist object) is left to the
        # caller; the kernel returns the distribution parameters (mu, std).


# -----------------------------------------------------------------------------
# Host-side parameter packing (pad to lane multiples, merge head, cast to bf16)
# -----------------------------------------------------------------------------
def pack_actor_params(params_f32, *, tk_max=2048):
    """Zero-pads feature dims to lane multiples, re-packs w3/b3 so the mu and
    log_std halves each occupy a lane-aligned a_pad slab of one merged head,
    casts weights to bf16 (biases stay f32).  tk is derived HERE, once, and
    returned with the packed params so the wrapper cannot mis-tile."""
    w1, b1 = params_f32["w1"], params_f32["b1"]
    w2, b2 = params_f32["w2"], params_f32["b2"]
    w3, b3 = params_f32["w3"], params_f32["b3"]
    repr_dim, hidden = w1.shape
    action_dim = w3.shape[1] // 2

    tk = _choose_tk(repr_dim, tk_max)
    k_pad = _round_up(repr_dim, tk)
    h_pad = _round_up(hidden, 128)
    a_pad = _round_up(action_dim, 128)

    def pad2(x, r, c):
        return jnp.pad(x, ((0, r - x.shape[0]), (0, c - x.shape[1])))

    w3_mu, w3_ls = w3[:, :action_dim], w3[:, action_dim:]
    b3_mu, b3_ls = b3[:, :action_dim], b3[:, action_dim:]
    w3_merged = jnp.concatenate(
        [pad2(w3_mu, h_pad, a_pad), pad2(w3_ls, h_pad, a_pad)], axis=1)
    b3_merged = jnp.concatenate(
        [pad2(b3_mu, 1, a_pad), pad2(b3_ls, 1, a_pad)], axis=1)

    return {
        "w1": pad2(w1, k_pad, h_pad).astype(jnp.bfloat16),
        "b1": pad2(b1, 1, h_pad).astype(jnp.float32),
        "w2": pad2(w2, h_pad, h_pad).astype(jnp.bfloat16),
        "b2": pad2(b2, 1, h_pad).astype(jnp.float32),
        "w3": w3_merged.astype(jnp.bfloat16),
        "b3": b3_merged.astype(jnp.float32),
        "tk": int(tk),
        "action_dim": int(action_dim),
        "repr_dim": int(repr_dim),
    }


# -----------------------------------------------------------------------------
# Wrapper
# -----------------------------------------------------------------------------
def actor_forward(obs, packed, *, vmem_budget_bytes=None):
    """obs: [B, repr_dim] f32; packed: output of pack_actor_params.
    Returns (mu [B, action_dim], std [B, action_dim]) in f32."""
    B, repr_dim = obs.shape
    assert repr_dim == packed["repr_dim"]
    action_dim = packed["action_dim"]
    tk = packed["tk"]
    k_pad, h_pad = packed["w1"].shape
    a_pad = packed["w3"].shape[1] // 2
    assert k_pad % tk == 0, "packed k_pad inconsistent with packed tk"

    budget = (_default_vmem_budget() if vmem_budget_bytes is None
              else int(vmem_budget_bytes))

    # Batch tiling: one M tile if it fits the VMEM budget (so w1 streams from
    # HBM exactly once).  Don't split just to feed both v7x cores — duplicated
    # w1 traffic would cost more than the extra TC gains.
    b_pad = _round_up(B, 8)
    tm = _choose_tm(b_pad, tk, h_pad, a_pad, budget)
    b_pad = _round_up(b_pad, tm)

    # Keep obs in f32 (kernel casts to bf16 on the VPU); pad only if needed.
    if b_pad != B or k_pad != repr_dim:
        obs_p = jnp.pad(obs, ((0, b_pad - B), (0, k_pad - repr_dim)))
    else:
        obs_p = obs
    obs_p = obs_p.astype(jnp.float32)

    grid = (b_pad // tm, k_pad // tk)

    def const_spec(shape):
        # Block index never changes -> single pipeline buffer (saves VMEM).
        return pl.BlockSpec(shape, lambda m, k: (0, 0),
                            pipeline_mode=pl.Buffered(1))

    mu_p, std_p = pl.pallas_call(
        actor_kernel,
        out_shape=(
            jax.ShapeDtypeStruct((b_pad, a_pad), jnp.float32),
            jax.ShapeDtypeStruct((b_pad, a_pad), jnp.float32),
        ),
        grid_spec=pltpu.PrefetchScalarGridSpec(
            num_scalar_prefetch=0,
            grid=grid,
            in_specs=[
                pl.BlockSpec((tm, tk), lambda m, k: (m, k)),      # obs tile (f32)
                pl.BlockSpec((tk, h_pad), lambda m, k: (k, 0)),   # w1 K-tile
                const_spec((1, h_pad)),                           # b1
                const_spec((h_pad, h_pad)),                       # w2
                const_spec((1, h_pad)),                           # b2
                const_spec((h_pad, 2 * a_pad)),                   # merged head w3
                const_spec((1, 2 * a_pad)),                       # merged head b3
            ],
            out_specs=(
                pl.BlockSpec((tm, a_pad), lambda m, k: (m, 0)),   # mu  (lane-dense)
                pl.BlockSpec((tm, a_pad), lambda m, k: (m, 0)),   # std (lane-dense)
            ),
            scratch_shapes=[pltpu.VMEM((tm, h_pad), jnp.float32)],  # layer-1 acc
        ),
        compiler_params=pltpu.CompilerParams(
            dimension_semantics=("parallel", "arbitrary"),
            vmem_limit_bytes=int(budget + 8 * 1024 * 1024),
        ),
    )(obs_p, packed["w1"], packed["b1"], packed["w2"], packed["b2"],
      packed["w3"], packed["b3"])

    # Un-pad in the wrapper (keeps the kernel epilogue lane-dense).
    return mu_p[:B, :action_dim], std_p[:B, :action_dim]


# -----------------------------------------------------------------------------
# Params + references
# -----------------------------------------------------------------------------
def init_actor_params(key, repr_dim, hidden_dim, action_dim):
    """Deterministic synthetic init (drq uses orthogonal init + zero bias;
    scaled normals + zero biases here). Weights stored as [in, out]."""
    k1, k2, k3 = jax.random.split(key, 3)
    scale = 0.1
    return {
        "w1": scale * jax.random.normal(k1, (repr_dim, hidden_dim), jnp.float32),
        "b1": jnp.zeros((1, hidden_dim), jnp.float32),
        "w2": scale * jax.random.normal(k2, (hidden_dim, hidden_dim), jnp.float32),
        "b2": jnp.zeros((1, hidden_dim), jnp.float32),
        "w3": scale * jax.random.normal(k3, (hidden_dim, 2 * action_dim), jnp.float32),
        "b3": jnp.zeros((1, 2 * action_dim), jnp.float32),
    }


def actor_reference_f32(obs, params, action_dim):
    """Pure-f32 reference of the module semantics."""
    h = jnp.maximum(obs @ params["w1"] + params["b1"], 0.0)
    h = jnp.maximum(h @ params["w2"] + params["b2"], 0.0)
    out = h @ params["w3"] + params["b3"]
    mu = out[:, :action_dim]
    log_std = jnp.tanh(out[:, action_dim:])
    lo, hi = LOG_STD_BOUNDS
    log_std = lo + 0.5 * (hi - lo) * (log_std + 1.0)
    return mu, jnp.exp(log_std)


def actor_reference_packed(obs, packed):
    """Reference mirroring the kernel's bf16-operand / f32-accumulate math."""
    action_dim = packed["action_dim"]
    k_pad = packed["w1"].shape[0]
    a_pad = packed["w3"].shape[1] // 2
    x = jnp.pad(obs, ((0, 0), (0, k_pad - obs.shape[1]))).astype(jnp.bfloat16)
    h = jnp.maximum(jnp.dot(x, packed["w1"],
                            preferred_element_type=jnp.float32) + packed["b1"], 0.0)
    h = h.astype(jnp.bfloat16)
    h = jnp.maximum(jnp.dot(h, packed["w2"],
                            preferred_element_type=jnp.float32) + packed["b2"], 0.0)
    h = h.astype(jnp.bfloat16)
    out = jnp.dot(h, packed["w3"],
                  preferred_element_type=jnp.float32) + packed["b3"]
    mu = out[:, :a_pad]
    ls = jnp.tanh(out[:, a_pad:])
    lo, hi = LOG_STD_BOUNDS
    ls = lo + 0.5 * (hi - lo) * (ls + 1.0)
    return mu[:, :action_dim], jnp.exp(ls)[:, :action_dim]


# -----------------------------------------------------------------------------
# Demo / correctness check at small shapes
# -----------------------------------------------------------------------------
if __name__ == "__main__":
    # Small shapes consistent with Actor(repr_dim, action_shape, hidden_dim,
    # hidden_depth=2, log_std_bounds=(-10, 2)).
    B = 8
    repr_dim = 32
    hidden_dim = 32
    action_dim = 4

    key = jax.random.PRNGKey(0)
    k_obs, k_params = jax.random.split(key)
    obs = jax.random.normal(k_obs, (B, repr_dim), jnp.float32)
    params = init_actor_params(k_params, repr_dim, hidden_dim, action_dim)
    packed = pack_actor_params(params)

    mu, std = actor_forward(obs, packed)
    jax.block_until_ready((mu, std))

    assert mu.shape == (B, action_dim) and std.shape == (B, action_dim)

    # Tight check vs a reference that mirrors the kernel's bf16/f32 math.
    mu_rp, std_rp = actor_reference_packed(obs, packed)
    assert jnp.allclose(mu, mu_rp, atol=1e-4, rtol=1e-4)
    assert jnp.allclose(std, std_rp, atol=1e-4, rtol=1e-4)

    # Loose check vs the pure-f32 module semantics (bf16 weight quantization).
    mu_rf, std_rf = actor_reference_f32(obs, params, action_dim)
    assert jnp.allclose(mu, mu_rf, atol=5e-2, rtol=5e-2)
    assert jnp.allclose(std, std_rf, atol=5e-2, rtol=5e-2)

    print("KERNEL_OK")
</pallas_src>

<mosaic_0001>
module attributes {stable_mosaic.version = 11 : i64} {
  func.func @actor_kernel(%arg0: i32, %arg1: i32, %arg2: memref<8x128xf32, #tpu.memory_space<vmem>>, %arg3: memref<128x128xbf16, #tpu.memory_space<vmem>>, %arg4: memref<1x128xf32, #tpu.memory_space<vmem>>, %arg5: memref<128x128xbf16, #tpu.memory_space<vmem>>, %arg6: memref<1x128xf32, #tpu.memory_space<vmem>>, %arg7: memref<128x256xbf16, #tpu.memory_space<vmem>>, %arg8: memref<1x256xf32, #tpu.memory_space<vmem>>, %arg9: memref<8x128xf32, #tpu.memory_space<vmem>>, %arg10: memref<8x128xf32, #tpu.memory_space<vmem>>, %arg11: memref<8x128xf32, #tpu.memory_space<vmem>>) attributes {dimension_semantics = [#tpu.dimension_semantics<parallel>, #tpu.dimension_semantics<arbitrary>], iteration_bounds = array<i64: 1, 1>, scalar_prefetch = 0 : i64, scratch_operands = 1 : i64, tpu.core_type = #tpu.core_type<tc>, window_params = [{transform_indices = @transform_0, window_bounds = array<i64: 8, 128>}, {transform_indices = @transform_1, window_bounds = array<i64: 128, 128>}, {pipeline_mode = #tpu.pipeline_mode<synchronous>, transform_indices = @transform_2, window_bounds = array<i64: 1, 128>}, {pipeline_mode = #tpu.pipeline_mode<synchronous>, transform_indices = @transform_3, window_bounds = array<i64: 128, 128>}, {pipeline_mode = #tpu.pipeline_mode<synchronous>, transform_indices = @transform_4, window_bounds = array<i64: 1, 128>}, {pipeline_mode = #tpu.pipeline_mode<synchronous>, transform_indices = @transform_5, window_bounds = array<i64: 128, 256>}, {pipeline_mode = #tpu.pipeline_mode<synchronous>, transform_indices = @transform_6, window_bounds = array<i64: 1, 256>}, {transform_indices = @transform_7, window_bounds = array<i64: 8, 128>}, {transform_indices = @transform_8, window_bounds = array<i64: 8, 128>}]} {
    %c0 = arith.constant 0 : index
    %c0_0 = arith.constant 0 : index
    %0 = vector.load %arg2[%c0, %c0_0] : memref<8x128xf32, #tpu.memory_space<vmem>>, vector<8x128xf32>
    %1 = arith.truncf %0 : vector<8x128xf32> to vector<8x128xbf16>
    %c0_1 = arith.constant 0 : index
    %c0_2 = arith.constant 0 : index
    %2 = vector.load %arg3[%c0_1, %c0_2] : memref<128x128xbf16, #tpu.memory_space<vmem>>, vector<128x128xbf16>
    %cst = arith.constant dense<0.000000e+00> : vector<8x128xf32>
    %3 = tpu.matmul %1, %2, %cst {dimension_numbers = #tpu.dot_dimension_numbers<[1], [0], [0], [1], [0, 0, 1, 1], [], []>} : vector<8x128xbf16>, vector<128x128xbf16>, vector<8x128xf32> -> vector<8x128xf32>
    %c0_i32 = arith.constant 0 : i32
    %4 = arith.cmpi eq, %arg1, %c0_i32 : i32
    %5 = arith.extui %4 : i1 to i32
    %c0_i32_3 = arith.constant 0 : i32
    %6 = arith.cmpi ne, %5, %c0_i32_3 : i32
    scf.if %6 {
      %c0_8 = arith.constant 0 : index
      %c0_9 = arith.constant 0 : index
      %13 = vector.load %arg11[%c0_8, %c0_9] : memref<8x128xf32, #tpu.memory_space<vmem>>, vector<8x128xf32>
      tpu.vector_store %arg11[%c0_8, %c0_9], %3 {strides = array<i32>} : memref<8x128xf32, #tpu.memory_space<vmem>>, vector<8x128xf32>,
    } else {
    }
    %c0_i32_4 = arith.constant 0 : i32
    %7 = arith.cmpi sgt, %arg1, %c0_i32_4 : i32
    %8 = arith.extui %7 : i1 to i32
    %c0_i32_5 = arith.constant 0 : i32
    %9 = arith.cmpi ne, %8, %c0_i32_5 : i32
    scf.if %9 {
      %c0_8 = arith.constant 0 : index
      %c0_9 = arith.constant 0 : index
      %13 = vector.load %arg11[%c0_8, %c0_9] : memref<8x128xf32, #tpu.memory_space<vmem>>, vector<8x128xf32>
      %14 = arith.addf %13, %3 : vector<8x128xf32>
      %c0_10 = arith.constant 0 : index
      %c0_11 = arith.constant 0 : index
      %15 = vector.load %arg11[%c0_10, %c0_11] : memref<8x128xf32, #tpu.memory_space<vmem>>, vector<8x128xf32>
      tpu.vector_store %arg11[%c0_10, %c0_11], %14 {strides = array<i32>} : memref<8x128xf32, #tpu.memory_space<vmem>>, vector<8x128xf32>,
    } else {
    }
    %c0_i32_6 = arith.constant 0 : i32
    %10 = arith.cmpi eq, %arg1, %c0_i32_6 : i32
    %11 = arith.extui %10 : i1 to i32
    %c0_i32_7 = arith.constant 0 : i32
    %12 = arith.cmpi ne, %11, %c0_i32_7 : i32
    scf.if %12 {
      %c0_8 = arith.constant 0 : index
      %c0_9 = arith.constant 0 : index
      %13 = vector.load %arg11[%c0_8, %c0_9] : memref<8x128xf32, #tpu.memory_space<vmem>>, vector<8x128xf32>
      %c0_10 = arith.constant 0 : index
      %c0_11 = arith.constant 0 : index
      %14 = vector.load %arg4[%c0_10, %c0_11] : memref<1x128xf32, #tpu.memory_space<vmem>>, vector<1x128xf32>
      %15 = vector.broadcast %14 : vector<1x128xf32> to vector<8x128xf32>
      %16 = arith.addf %13, %15 : vector<8x128xf32>
      %cst_12 = arith.constant 0.000000e+00 : f32
      %17 = vector.broadcast %cst_12 : f32 to vector<8x128xf32>
      %18 = arith.maximumf %16, %17 : vector<8x128xf32>
      %19 = arith.truncf %18 : vector<8x128xf32> to vector<8x128xbf16>
      %c0_13 = arith.constant 0 : index
      %c0_14 = arith.constant 0 : index
      %20 = vector.load %arg5[%c0_13, %c0_14] : memref<128x128xbf16, #tpu.memory_space<vmem>>, vector<128x128xbf16>
      %cst_15 = arith.constant dense<0.000000e+00> : vector<8x128xf32>
      %21 = tpu.matmul %19, %20, %cst_15 {dimension_numbers = #tpu.dot_dimension_numbers<[1], [0], [0], [1], [0, 0, 1, 1], [], []>} : vector<8x128xbf16>, vector<128x128xbf16>, vector<8x128xf32> -> vector<8x128xf32>
      %c0_16 = arith.constant 0 : index
      %c0_17 = arith.constant 0 : index
      %22 = vector.load %arg6[%c0_16, %c0_17] : memref<1x128xf32, #tpu.memory_space<vmem>>, vector<1x128xf32>
      %23 = vector.broadcast %22 : vector<1x128xf32> to vector<8x128xf32>
      %24 = arith.addf %21, %23 : vector<8x128xf32>
      %cst_18 = arith.constant 0.000000e+00 : f32
      %25 = vector.broadcast %cst_18 : f32 to vector<8x128xf32>
      %26 = arith.maximumf %24, %25 : vector<8x128xf32>
      %27 = arith.truncf %26 : vector<8x128xf32> to vector<8x128xbf16>
      %c0_19 = arith.constant 0 : index
      %c0_20 = arith.constant 0 : index
      %28 = vector.load %arg7[%c0_19, %c0_20] : memref<128x256xbf16, #tpu.memory_space<vmem>>, vector<128x256xbf16>
      %cst_21 = arith.constant dense<0.000000e+00> : vector<8x256xf32>
      %29 = tpu.matmul %27, %28, %cst_21 {dimension_numbers = #tpu.dot_dimension_numbers<[1], [0], [0], [1], [0, 0, 1, 1], [], []>} : vector<8x128xbf16>, vector<128x256xbf16>, vector<8x256xf32> -> vector<8x256xf32>
      %c0_22 = arith.constant 0 : index
      %c0_23 = arith.constant 0 : index
      %30 = vector.load %arg8[%c0_22, %c0_23] : memref<1x256xf32, #tpu.memory_space<vmem>>, vector<1x256xf32>
      %31 = vector.broadcast %30 : vector<1x256xf32> to vector<8x256xf32>
      %32 = arith.addf %29, %31 : vector<8x256xf32>
      %33 = vector.extract_strided_slice %32 {offsets = [0, 0], sizes = [8, 128], strides = [1, 1]} : vector<8x256xf32> to vector<8x128xf32>
      %34 = vector.extract_strided_slice %32 {offsets = [0, 128], sizes = [8, 128], strides = [1, 1]} : vector<8x256xf32> to vector<8x128xf32>
      %35 = math.tanh %34 : vector<8x128xf32>
      %cst_24 = arith.constant 1.000000e+00 : f32
      %36 = vector.broadcast %cst_24 : f32 to vector<8x128xf32>
      %37 = arith.addf %35, %36 : vector<8x128xf32>
      %cst_25 = arith.constant 6.000000e+00 : f32
      %38 = vector.broadcast %cst_25 : f32 to vector<8x128xf32>
      %39 = arith.mulf %38, %37 : vector<8x128xf32>
      %cst_26 = arith.constant -1.000000e+01 : f32
      %40 = vector.broadcast %cst_26 : f32 to vector<8x128xf32>
      %41 = arith.addf %40, %39 : vector<8x128xf32>
      %c0_27 = arith.constant 0 : index
      %c0_28 = arith.constant 0 : index
      %42 = vector.load %arg9[%c0_27, %c0_28] : memref<8x128xf32, #tpu.memory_space<vmem>>, vector<8x128xf32>
      tpu.vector_store %arg9[%c0_27, %c0_28], %33 {strides = array<i32>} : memref<8x128xf32, #tpu.memory_space<vmem>>, vector<8x128xf32>,
      %43 = math.exp %41 : vector<8x128xf32>
      %c0_29 = arith.constant 0 : index
      %c0_30 = arith.constant 0 : index
      %44 = vector.load %arg10[%c0_29, %c0_30] : memref<8x128xf32, #tpu.memory_space<vmem>>, vector<8x128xf32>
      tpu.vector_store %arg10[%c0_29, %c0_30], %43 {strides = array<i32>} : memref<8x128xf32, #tpu.memory_space<vmem>>, vector<8x128xf32>,
    } else {
    }
    return
  }
  func.func @transform_0(%arg0: i32, %arg1: i32) -> (i32, i32) {
    %c0_i32 = arith.constant 0 : i32
    return %arg0, %arg1 : i32, i32
  }
  func.func @transform_1(%arg0: i32, %arg1: i32) -> (i32, i32) {
    %c0_i32 = arith.constant 0 : i32
    %c0_i32_0 = arith.constant 0 : i32
    return %arg1, %c0_i32 : i32, i32
  }
  func.func @transform_2(%arg0: i32, %arg1: i32) -> (i32, i32) {
    %c0_i32 = arith.constant 0 : i32
    %c0_i32_0 = arith.constant 0 : i32
    %c0_i32_1 = arith.constant 0 : i32
    return %c0_i32, %c0_i32_0 : i32, i32
  }
  func.func @transform_3(%arg0: i32, %arg1: i32) -> (i32, i32) {
    %c0_i32 = arith.constant 0 : i32
    %c0_i32_0 = arith.constant 0 : i32
    %c0_i32_1 = arith.constant 0 : i32
    return %c0_i32, %c0_i32_0 : i32, i32
  }
  func.func @transform_4(%arg0: i32, %arg1: i32) -> (i32, i32) {
    %c0_i32 = arith.constant 0 : i32
    %c0_i32_0 = arith.constant 0 : i32
    %c0_i32_1 = arith.constant 0 : i32
    return %c0_i32, %c0_i32_0 : i32, i32
  }
  func.func @transform_5(%arg0: i32, %arg1: i32) -> (i32, i32) {
    %c0_i32 = arith.constant 0 : i32
    %c0_i32_0 = arith.constant 0 : i32
    %c0_i32_1 = arith.constant 0 : i32
    return %c0_i32, %c0_i32_0 : i32, i32
  }
  func.func @transform_6(%arg0: i32, %arg1: i32) -> (i32, i32) {
    %c0_i32 = arith.constant 0 : i32
    %c0_i32_0 = arith.constant 0 : i32
    %c0_i32_1 = arith.constant 0 : i32
    return %c0_i32, %c0_i32_0 : i32, i32
  }
  func.func @transform_7(%arg0: i32, %arg1: i32) -> (i32, i32) {
    %c0_i32 = arith.constant 0 : i32
    %c0_i32_0 = arith.constant 0 : i32
    return %arg0, %c0_i32 : i32, i32
  }
  func.func @transform_8(%arg0: i32, %arg1: i32) -> (i32, i32) {
    %c0_i32 = arith.constant 0 : i32
    %c0_i32_0 = arith.constant 0 : i32
    return %arg0, %c0_i32 : i32, i32
  }
}

</mosaic_0001>

<bundles_post_ra>
// kernel: tpu_custom_call.1
= control target key start
LH: loop header
LB: loop body
LE: loop exit
PB: predicated region body
PF: predicated region fallthrough
CT: control target
= control target key end

     0   :  { %14 = vsyncpa [#allocation4], 0  ;;  %s953_s0 = inlined_call_operand.hbm [shape: f32[8,128], index: 0, kind: input, shape index: {}]   ;;  %s954_s1 = inlined_call_operand.hbm [shape: bf16[128,128], index: 1, kind: input, shape index: {}]   ;;  %s955_s2 = inlined_call_operand.vmem [shape: f32[1,128], index: 2, kind: input, shape index: {}]   ;;  %s956_s3 = inlined_call_operand.hbm [shape: bf16[128,128], index: 3, kind: input, shape index: {}]   ;;  %s957_s4 = inlined_call_operand.vmem [shape: f32[1,128], index: 4, kind: input, shape index: {}]   ;;  %s958_s5 = inlined_call_operand.hbm [shape: bf16[128,256], index: 5, kind: input, shape index: {}]   ;;  %s959_s6 = inlined_call_operand.vmem [shape: f32[1,256], index: 6, kind: input, shape index: {}]   ;;  %s960_s7 = inlined_call_operand.hbm [shape: f32[8,128], index: 7, kind: output, shape index: {0}]   ;;  %s961_s8 = inlined_call_operand.hbm [shape: f32[8,128], index: 8, kind: output, shape index: {1}]  }
   0x1   :  { %15 = vsyncpa [#allocation7], 0 }
   0x2   :  { %16 = vsyncpa [#allocation10], 0 }
   0x3   :  { %17 = vsyncpa [#allocation5], 0 }
   0x4   :  { %18 = vsyncpa [#allocation13], 0  ;;  %s808_s27 = smov [#allocation6]   ;;  %s666_s9 = scalar_lea.hbm %s954_s1, 1024 }
   0x5   :  { %s34_s28 = sshll.u32 %s808_s27, 4  ;;  %p667_p0 = scmp.ne.s32.totalorder %s954_s1, %s666_s9  ;;  %s35_s28 = int_to_ptr.vmem [resolvable:$true] %s34_s28 }
   0x6   :  { %p670_p1 = scmp.lt.u32.totalorder %s666_s9, %s954_s1 }
   0x8   :  { %p672_p2 = pnand %p670_p1, %p667_p0 }
   0xa   :  { %675 = shalt.err (!%p672_p2)
}
   0xb   :  { %s676_s14 = scalar_lea.vmem %s35_s28, 1024  ;;  %p681_p4 = scmp.lt.s32.totalorder %s35_s28, %s35_s28 }
   0xc   :  { %p677_p3 = scmp.ne.s32.totalorder %s35_s28, %s676_s14  ;;  %p682_p5 = scmp.lt.s32.totalorder %s676_s14, %s676_s14 }
   0xe   :  { %p683_p6 = por %p682_p5, %p681_p4 }
  0x10   :  { %p684_p7 = pnand %p683_p6, %p677_p3 }
  0x12   :  { %687 = shalt.err (!%p684_p7)
}
  0x13   :  { %s809_s15 = smov 64   ;;  %s810_s16 = smov 4  }
  0x14   :  { %40 = dma.hbm_to_vmem [thread:$0]  %s954_s1, 1024, %s35_s28, [#allocation7], %s809_s15, %s809_s15, %s810_s16  }
  0x15   :  { %s811_s19 = smov [#allocation3]   ;;  %s812_s21 = smov [#allocation8]  }
  0x16   :  { %s25_s20 = sshll.u32 %s811_s19, 4  ;;  %s48_s22 = sshll.u32 %s812_s21, 4  ;;  %s26_s20 = int_to_ptr.vmem [resolvable:$true] %s25_s20  ;;  %s49_s22 = int_to_ptr.vmem [resolvable:$true] %s48_s22 }
  0x17   :  { %s688_s25 = scalar_lea.hbm %s953_s0, 128 }
  0x18   :  { %p689_p8 = scmp.ne.s32.totalorder %s953_s0, %s688_s25  ;;  %p692_p9 = scmp.lt.u32.totalorder %s688_s25, %s953_s0 }
  0x1a   :  { %p694_p10 = pnand %p692_p9, %p689_p8 }
  0x1c   :  { %697 = shalt.err (!%p694_p10)
}
  0x1d   :  { %s698_s1 = scalar_lea.vmem %s26_s20, 128  ;;  %p703_p12 = scmp.lt.s32.totalorder %s26_s20, %s26_s20 }
  0x1e   :  { %p699_p11 = scmp.ne.s32.totalorder %s26_s20, %s698_s1  ;;  %p704_p13 = scmp.lt.s32.totalorder %s698_s1, %s698_s1 }
  0x20   :  { %p705_p0 = por %p704_p13, %p703_p12 }
  0x22   :  { %p706_p1 = pnand %p705_p0, %p699_p11 }
  0x24   :  { %709 = shalt.err (!%p706_p1)
}
  0x25   :  { %28 = dma.hbm_to_vmem [thread:$0]  %s953_s0, 128, %s26_s20, [#allocation4]  }
  0x26   :  { %s710_s12 = scalar_lea.hbm %s956_s3, 1024 }
  0x27   :  { %p711_p2 = scmp.ne.s32.totalorder %s956_s3, %s710_s12  ;;  %p714_p3 = scmp.lt.u32.totalorder %s710_s12, %s956_s3 }
  0x29   :  { %p716_p4 = pnand %p714_p3, %p711_p2 }
  0x2b   :  { %719 = shalt.err (!%p716_p4)
}
  0x2c   :  { %s720_s19 = scalar_lea.vmem %s49_s22, 1024  ;;  %p725_p6 = scmp.lt.s32.totalorder %s49_s22, %s49_s22 }
  0x2d   :  { %p721_p5 = scmp.ne.s32.totalorder %s49_s22, %s720_s19  ;;  %p726_p7 = scmp.lt.s32.totalorder %s720_s19, %s720_s19 }
  0x2f   :  { %p727_p8 = por %p726_p7, %p725_p6 }
  0x31   :  { %p728_p9 = pnand %p727_p8, %p721_p5 }
  0x33   :  { %731 = shalt.err (!%p728_p9)
}
  0x34   :  { %54 = dma.hbm_to_vmem [thread:$0]  %s956_s3, 1024, %s49_s22, [#allocation7], %s809_s15, %s809_s15, %s810_s16  }
  0x35   :  { %s813_s21 = smov [#allocation9]   ;;  %s732_s26 = scalar_lea.hbm %s958_s5, 2048 }
  0x36   :  { %s62_s23 = sshll.u32 %s813_s21, 4  ;;  %p733_p10 = scmp.ne.s32.totalorder %s958_s5, %s732_s26  ;;  %s63_s23 = int_to_ptr.vmem [resolvable:$true] %s62_s23 }
  0x37   :  { %p736_p11 = scmp.lt.u32.totalorder %s732_s26, %s958_s5 }
  0x39   :  { %p738_p12 = pnand %p736_p11, %p733_p10 }
  0x3b   :  { %741 = shalt.err (!%p738_p12)
}
  0x3c   :  { %s742_s28 = scalar_lea.vmem %s63_s23, 2048  ;;  %p747_p0 = scmp.lt.s32.totalorder %s63_s23, %s63_s23 }
  0x3d   :  { %p743_p13 = scmp.ne.s32.totalorder %s63_s23, %s742_s28  ;;  %p748_p1 = scmp.lt.s32.totalorder %s742_s28, %s742_s28 }
  0x3f   :  { %p749_p2 = por %p748_p1, %p747_p0 }
  0x41   :  { %p750_p3 = pnand %p749_p2, %p743_p13 }
  0x43   :  { %753 = shalt.err (!%p750_p3)
}
  0x44   :  { %s814_s3 = smov 128   ;;  %s815_s15 = smov 8  }
  0x45   :  { %68 = dma.hbm_to_vmem [thread:$0]  %s958_s5, 2048, %s63_s23, [#allocation10], %s814_s3, %s814_s3, %s815_s15  }
  0x46   :  { %798 = dma.done.wait [#allocation4], 128  }
  0x47   :  { %799 = vsyncadd [#allocation4], 4294967168 }
  0x48   :  { %800 = dma.done.wait [#allocation7], 2048  }
  0x49   :  { %801 = vsyncadd [#allocation7], 4294965248 }
  0x4a   :  { %802 = dma.done.wait [#allocation10], 2048  }
  0x4b   :  { %803 = vsyncadd [#allocation10], 4294965248  ;;  %v816_v0 = vmov 0.0   ;;  %vm817_vm0 = vmmov 0   ;;  %v622_v1 = vld [vmem:[#allocation6] sm:$0xff]   ;;  %v623_v2 = vld [vmem:[#allocation6 + $0x8] sm:$0xff]   ;;  %v347_v52 = vlaneseq }
  0x4c   :  { %569 = vmatprep.subr.bf16.mxu0 %v816_v0  ;;  %585 = vmatprep.mubr.msk.bf16.mxu0 %vm817_vm0, %v816_v0  ;;  %v624_v3 = vld [vmem:[#allocation6 + $0x10] sm:$0xff]   ;;  %v630_v4 = vld [vmem:[#allocation8] sm:$0xff]   ;;  %v625_v5 = vld [vmem:[#allocation6 + $0x18] sm:$0xff]   ;;  %v818_v43 = vmov 0   ;;  %s819_s13 = smov [#allocation11]  }
  0x4d   :  { %589 = vmatprep.subr.bf16.mxu1 %v816_v0  ;;  %605 = vmatprep.mubr.msk.bf16.mxu1 %vm817_vm0, %v816_v0  ;;  %v631_v6 = vld [vmem:[#allocation8 + $0x8] sm:$0xff]   ;;  %v626_v7 = vld [vmem:[#allocation6 + $0x20] sm:$0xff]   ;;  %v632_v8 = vld [vmem:[#allocation8 + $0x10] sm:$0xff]   ;;  %v348_v53 = vshrl.u32 %v347_v52, 7 }
  0x4e   :  { %570 = vmatpush3.bf16.msra.mxu0 %v622_v1  ;;  %590 = vmatpush3.bf16.msra.mxu1 %v630_v4  ;;  %v627_v9 = vld [vmem:[#allocation6 + $0x28] sm:$0xff]   ;;  %v633_v10 = vld [vmem:[#allocation8 + $0x18] sm:$0xff]   ;;  %v628_v11 = vld [vmem:[#allocation6 + $0x30] sm:$0xff]  }
  0x4f   :  { %571 = vmatprep.subr.bf16.mxu0 %v816_v0  ;;  %591 = vmatprep.subr.bf16.mxu1 %v816_v0  ;;  %v634_v12 = vld [vmem:[#allocation8 + $0x20] sm:$0xff]   ;;  %v629_v13 = vld [vmem:[#allocation6 + $0x38] sm:$0xff]   ;;  %v635_v15 = vld [vmem:[#allocation8 + $0x28] sm:$0xff]   ;;  %v349_v54 = vsub.s32 0, %v348_v53  ;;  %v353_v56 = vsub.s32 1, %v348_v53 }
  0x50   :  { %v84_v14 = vld [vmem:[#allocation3] sm:$0xff]  ;;  %v636_v17 = vld [vmem:[#allocation8 + $0x30] sm:$0xff]   ;;  %v638_v19 = vld [vmem:[#allocation9] ss:$8 sps:$4 sm:$0xff]  }
  0x51   :  { %v85_v16 = vpack.c.bf16 %v84_v14, %v84_v14  ;;  %v637_v18 = vld [vmem:[#allocation8 + $0x38] sm:$0xff]   ;;  %v640_v20 = vld [vmem:[#allocation9 + $0x4] ss:$8 sps:$4 sm:$0xff]   ;;  %v644_v24 = vld [vmem:[#allocation9 + $0x20] ss:$8 sps:$4 sm:$0xff]  }
  0x52   :  { %572 = vmatpush3.bf16.msra.mxu0 %v623_v2  ;;  %592 = vmatpush3.bf16.msra.mxu1 %v631_v6  ;;  %v643_v21 = vld [vmem:[#allocation9 + $0x14] ss:$8 sps:$4 sm:$0xff]   ;;  %v641_v22 = vld [vmem:[#allocation9 + $0x10] ss:$8 sps:$4 sm:$0xff]   ;;  %v646_v23 = vld [vmem:[#allocation9 + $0x24] ss:$8 sps:$4 sm:$0xff]  }
  0x53   :  { %573 = vmatprep.subr.bf16.mxu0 %v816_v0  ;;  %593 = vmatprep.subr.bf16.mxu1 %v816_v0  ;;  %v649_v25 = vld [vmem:[#allocation9 + $0x34] ss:$8 sps:$4 sm:$0xff]   ;;  %v647_v26 = vld [vmem:[#allocation9 + $0x30] ss:$8 sps:$4 sm:$0xff]   ;;  %v652_v27 = vld [vmem:[#allocation9 + $0x44] ss:$8 sps:$4 sm:$0xff]  }
  0x54   :  { %v650_v28 = vld [vmem:[#allocation9 + $0x40] ss:$8 sps:$4 sm:$0xff]   ;;  %v655_v29 = vld [vmem:[#allocation9 + $0x54] ss:$8 sps:$4 sm:$0xff]   ;;  %v653_v30 = vld [vmem:[#allocation9 + $0x50] ss:$8 sps:$4 sm:$0xff]  }
  0x55   :  { %v658_v31 = vld [vmem:[#allocation9 + $0x64] ss:$8 sps:$4 sm:$0xff]   ;;  %v656_v32 = vld [vmem:[#allocation9 + $0x60] ss:$8 sps:$4 sm:$0xff]   ;;  %v525_v33 = vld [vmem:[%s955_s2] ss:$0 sm:$0xff] }
  0x56   :  { %574 = vmatpush3.bf16.msra.mxu0 %v624_v3  ;;  %594 = vmatpush3.bf16.msra.mxu1 %v632_v8  ;;  %v661_v41 = vld [vmem:[#allocation9 + $0x74] ss:$8 sps:$4 sm:$0xff]   ;;  %v659_v42 = vld [vmem:[#allocation9 + $0x70] ss:$8 sps:$4 sm:$0xff]  }
  0x57   :  { %575 = vmatprep.subr.bf16.mxu0 %v816_v0  ;;  %595 = vmatprep.subr.bf16.mxu1 %v816_v0  ;;  %v526_v44 = vld [vmem:[%s957_s4] ss:$0 sm:$0xff]  ;;  %s492_s4 = sshll.u32 %s819_s13, 4  ;;  %s493_s4 = int_to_ptr.vmem [resolvable:$true] %s492_s4 }
  0x58   :  { %v345_v55 = vld [vmem:[%s959_s6] sm:$0x3]  ;;  %s754_s14 = scalar_lea.vmem %s493_s4, 128  ;;  %p759_p5 = scmp.lt.s32.totalorder %s493_s4, %s493_s4 }
  0x59   :  { %v350_v57 = vrot.slane %v345_v55, %v349_v54  ;;  %v354_v58 = vrot.slane %v345_v55, %v353_v56  ;;  %p755_p4 = scmp.ne.s32.totalorder %s493_s4, %s754_s14  ;;  %p760_p6 = scmp.lt.s32.totalorder %s754_s14, %s754_s14 }
  0x5a   :  { %576 = vmatpush3.bf16.msra.mxu0 %v625_v5  ;;  %596 = vmatpush3.bf16.msra.mxu1 %v633_v10 }
  0x5b   :  { %577 = vmatprep.subr.bf16.mxu0 %v816_v0  ;;  %597 = vmatprep.subr.bf16.mxu1 %v816_v0  ;;  %p761_p7 = por %p760_p6, %p759_p5 }
  0x5d   :  { %p762_p8 = pnand %p761_p7, %p755_p4 }
  0x5e   :  { %578 = vmatpush3.bf16.msra.mxu0 %v626_v7  ;;  %598 = vmatpush3.bf16.msra.mxu1 %v634_v12 }
  0x5f   :  { %579 = vmatprep.subr.bf16.mxu0 %v816_v0  ;;  %599 = vmatprep.subr.bf16.mxu1 %v816_v0 }
  0x62   :  { %580 = vmatpush3.bf16.msra.mxu0 %v627_v9  ;;  %600 = vmatpush3.bf16.msra.mxu1 %v635_v15 }
  0x63   :  { %581 = vmatprep.subr.bf16.mxu0 %v816_v0  ;;  %601 = vmatprep.subr.bf16.mxu1 %v816_v0 }
  0x66   :  { %582 = vmatpush3.bf16.msra.mxu0 %v628_v11  ;;  %602 = vmatpush3.bf16.msra.mxu1 %v636_v17 }
  0x67   :  { %583 = vmatprep.subr.bf16.mxu0 %v816_v0  ;;  %603 = vmatprep.subr.bf16.mxu1 %v816_v0 }
  0x6a   :  { %584 = vmatpush3.bf16.msra.mxu0 %v629_v13  ;;  %604 = vmatpush3.bf16.msra.mxu1 %v637_v18 }
  0x6b   :  { %437 = vmatprep.subr.bf16.mxu0 %v640_v20 }
  0x6d   :  { %586 = vmatmul.mubr.bf16.vlgmr.msra.gmra.mrb[0].mxu0 %v85_v16 }
  0x6e   :  { %438 = vmatpush1.bf16.msra.mxu0 %v638_v19  ;;  %469 = vmatprep.mubr.bf16.mxu0 %v818_v43 }
  0x6f   :  { %439 = vmatprep.subr.bf16.mxu0 %v643_v21 }
  0x72   :  { %440 = vmatpush1.bf16.msra.mxu0 %v641_v22 }
  0x73   :  { %441 = vmatprep.subr.bf16.mxu0 %v646_v23 }
  0x76   :  { %442 = vmatpush1.bf16.msra.mxu0 %v644_v24 }
  0x77   :  { %443 = vmatprep.subr.bf16.mxu0 %v649_v25 }
  0x7a   :  { %444 = vmatpush1.bf16.msra.mxu0 %v647_v26 }
  0x7b   :  { %445 = vmatprep.subr.bf16.mxu0 %v652_v27 }
  0x7e   :  { %446 = vmatpush1.bf16.msra.mxu0 %v650_v28 }
  0x7f   :  { %447 = vmatprep.subr.bf16.mxu0 %v655_v29 }
  0x82   :  { %448 = vmatpush1.bf16.msra.mxu0 %v653_v30 }
  0x83   :  { %449 = vmatprep.subr.bf16.mxu0 %v658_v31 }
  0x86   :  { %450 = vmatpush1.bf16.msra.mxu0 %v656_v32 }
  0x87   :  { %451 = vmatprep.subr.bf16.mxu0 %v661_v41 }
  0x8a   :  { %452 = vmatpush1.bf16.msra.mxu0 %v659_v42 }
 0x140   :  { %v184_v34 = vpop.f32.mrb[0].mxu0 }
 0x141   :  { %v213_v35 = vadd.f32 %v525_v33, %v184_v34  ;;  %v587_v36 = vpop.f32.mrb[1].mxu0 }
 0x142   :  { %v187_v37 = vpop.f32.mrb[2].mxu0 }
 0x143   :  { %v214_v38 = vmax.f32 %v213_v35, 0.0  ;;  %v588_v39 = vpop.f32.mrb[3].mxu0 }
 0x145   :  { %v215_v40 = vpack.c.bf16 %v214_v38, %v214_v38 }
 0x147   :  { %606 = vmatmul.mubr.bf16.vlgmr.msra.gmra.mrb[0].mxu1 %v215_v40 }
 0x21a   :  { %v321_v45 = vpop.f32.mrb[0].mxu1 }
 0x21b   :  { %v322_v46 = vadd.f32 %v526_v44, %v321_v45  ;;  %v607_v47 = vpop.f32.mrb[1].mxu1 }
 0x21c   :  { %v324_v48 = vpop.f32.mrb[2].mxu1 }
 0x21d   :  { %v327_v49 = vmax.f32 %v322_v46, 0.0  ;;  %v608_v50 = vpop.f32.mrb[3].mxu1 }
 0x21f   :  { %v328_v51 = vpack.c.bf16 %v327_v49, %v327_v49 }
 0x221   :  { %470 = vmatmul.mubr.bf16.vlgmr.msra.gmra.mrb[4].mxu0 %v328_v51 }
 0x2f4   :  { %v471_v59 = vpop.f32.mrb[4].mxu0 }
 0x2f5   :  { %v472_v60 = vadd.f32 %v471_v59, %v350_v57  ;;  %v473_v61 = vpop.f32.mrb[5].mxu0 }
 0x2f6   :  { %v474_v62 = vadd.f32 %v473_v61, %v354_v58  ;;  %v475_v63 = vpop.f32.mrb[6].mxu0 }
 0x2f7   :  { %482 = vst [vmem:[#allocation11] sm:$0xff] %v472_v60  ;;  %v476_v0 = vpop.f32.mrb[7].mxu0 }
 0x2f8   :  { %662 = vtanh.f32 %v474_v62 }
 0x2f9   :  { %765 = shalt.err (!%p762_p8)
}
 0x2fa   :  { %s766_s18 = scalar_lea.hbm %s960_s7, 128 }
 0x2fb   :  { %p767_p9 = scmp.ne.s32.totalorder %s960_s7, %s766_s18  ;;  %p770_p10 = scmp.lt.u32.totalorder %s766_s18, %s960_s7 }
 0x2fd   :  { %p772_p11 = pnand %p770_p10, %p767_p9 }
 0x2ff   :  { %775 = shalt.err (!%p772_p11)
}
 0x300   :  { %495 = dma.vmem_to_hbm [thread:$0]  %s493_s4, 128, %s960_s7, [#allocation5]  }
 0x301   :  { %s820_s25 = smov [#allocation12]  }
 0x302   :  { %v663_v1 = vpop.eup %662  ;;  %s502_s26 = sshll.u32 %s820_s25, 4  ;;  %s503_s26 = int_to_ptr.vmem [resolvable:$true] %s502_s26 }
 0x303   :  { %v479_v2 = vadd.f32 1.0, %v663_v1  ;;  %s776_s27 = scalar_lea.vmem %s503_s26, 128  ;;  %p781_p13 = scmp.lt.s32.totalorder %s503_s26, %s503_s26 }
 0x304   :  { %p777_p12 = scmp.ne.s32.totalorder %s503_s26, %s776_s27  ;;  %p782_p0 = scmp.lt.s32.totalorder %s776_s27, %s776_s27 }
 0x305   :  { %v480_v3 = vmul.f32 6.0, %v479_v2 }
 0x306   :  { %p783_p1 = por %p782_p0, %p781_p13 }
 0x307   :  { %v481_v4 = vadd.f32 -10.0, %v480_v3 }
 0x308   :  { %p784_p2 = pnand %p783_p1, %p777_p12 }
 0x309   :  { %v483_v5 = vmul.f32 1.442695, %v481_v4 }
 0x30b   :  { %664 = vpow2.f32 %v483_v5 }
 0x315   :  { %v665_v6 = vpop.eup %664 }
 0x316   :  { %485 = vst [vmem:[#allocation12] sm:$0xff] %v665_v6 }
 0x317   :  { %787 = shalt.err (!%p784_p2)
}
 0x318   :  { %s788_s30 = scalar_lea.hbm %s961_s8, 128 }
 0x319   :  { %p789_p3 = scmp.ne.s32.totalorder %s961_s8, %s788_s30  ;;  %p792_p4 = scmp.lt.u32.totalorder %s788_s30, %s961_s8 }
 0x31b   :  { %p794_p5 = pnand %p792_p4, %p789_p3 }
 0x31d   :  { %797 = shalt.err (!%p794_p5)
}
 0x31e   :  { %505 = dma.vmem_to_hbm [thread:$0]  %s503_s26, 128, %s961_s8, [#allocation13]  }
 0x31f   :  { %804 = dma.done.wait [#allocation5], 128  }
 0x320   :  { %805 = vsyncadd [#allocation5], 4294967168 }
 0x321   :  { %806 = dma.done.wait [#allocation13], 128  }
 0x322   :  { %807 = vsyncadd [#allocation13], 4294967168 }
 0x323   :  { %512 = vsyncpa [#allocation4], 1 }
 0x324   :  { %513 = vsyncpa [#allocation7], 1 }
 0x325   :  { %514 = vsyncpa [#allocation10], 1 }
 0x326   :  { %515 = vsyncpa [#allocation5], 1 }
 0x327   :  { %516 = vsyncpa [#allocation13], 1 }

</bundles_post_ra>
